<compile_context>
chip_gen: v5e
topology: v5e:2x2
jax: 0.10.0
libtpu: 0.0.40
codegen_flags: <defaults>
</compile_context>

<pallas_src>
import math
import functools

import jax
import jax.numpy as jnp
import numpy as np
from jax.experimental import pallas as pl
from jax.experimental.pallas import tpu as pltpu


def _pe_kernel(pos_ref, e_ref, out_ref):
    """One row-tile of the positional encoding.

    pos_ref : (rows_tile, K_pad)   packed positions | 1.0 | zero padding
    e_ref   : (K_pad, width)       block-diagonal div_term pattern + phase row
    out_ref : (rows_tile, width)   width = k*H, a multiple of 128 (lane-dense)
    """
    # One MXU matmul expands each packed position across its H lanes and adds
    # the +pi/2 phase for the cos half (via the ones column of pos_ref).
    arg = jnp.dot(
        pos_ref[...],
        e_ref[...],
        preferred_element_type=jnp.float32,
        precision=jax.lax.Precision.HIGHEST,   # keep f32 accuracy on the MXU
    )
    # sin is a VPU polynomial; single unmasked full-width store, cast at store.
    out_ref[...] = jnp.sin(arg).astype(out_ref.dtype)


def float_positional_encoding(position: jax.Array, out_size: int,
                              *, out_dtype=jnp.float32) -> jax.Array:
    """position: [B, T] float -> pe: [B, T, out_size] (out_dtype, default f32)."""
    assert out_size % 2 == 0, "out_size must be even"
    H = out_size
    half = H // 2
    B, T = position.shape
    position = position.astype(jnp.float32)

    # --- lane-dense packing: k time steps per row so k*H % 128 == 0 ---------
    k = 128 // math.gcd(H, 128)          # H is even -> k <= 64
    width = k * H

    T_pad = -(-T // k) * k
    if T_pad != T:
        position = jnp.pad(position, ((0, 0), (0, T_pad - T)))
    rows_per_b = T_pad // k
    total_rows = B * rows_per_b          # batch flattened into the row axis

    pos_packed = position.reshape(total_rows, k)
    K = k + 1                            # ones column folds the phase add in
    K_pad = -(-K // 8) * 8               # sublane-align the contraction dim
    aug = jnp.concatenate(
        [pos_packed,
         jnp.ones((total_rows, 1), jnp.float32),
         jnp.zeros((total_rows, K_pad - K), jnp.float32)],
        axis=1)                          # (total_rows, K_pad)

    # --- E matrix: E[s, s*H + j] = mult[j], E[k, :] = phase tiled k times ---
    div_term = np.exp(
        np.arange(0, H, 2, dtype=np.float32)
        * np.float32(-math.log(10000.0) / H)).astype(np.float32)   # (H/2,)
    mult_t = np.concatenate([div_term, div_term])                  # (H,) sin|cos
    phase_t = np.concatenate([np.zeros(half, np.float32),
                              np.full(half, math.pi / 2.0, np.float32)])
    E = np.zeros((K_pad, width), np.float32)
    for s in range(k):
        E[s, s * H:(s + 1) * H] = mult_t
    E[k, :] = np.tile(phase_t, k)
    E = jnp.asarray(E)

    # --- row tiling: explicit VMEM budget (blocks + in-kernel temporaries) --
    out_bytes = jnp.dtype(out_dtype).itemsize
    pos_lanes = -(-K_pad // 128) * 128           # pos lane dim padded in VMEM
    per_row = (2 * width * out_bytes             # output block, double-buffered
               + 2 * pos_lanes * 4               # pos block, double-buffered
               + 2 * width * 4)                  # f32 matmul/sin temporaries
    e_foot = 2 * K_pad * width * 4               # E (tiny, double-buffered)
    budget = 24 * 1024 * 1024                    # working-set target, all gens
    rows_tile = max(8, ((budget - e_foot) // per_row) // 8 * 8)
    if rows_tile >= total_rows:
        rows_tile = total_rows                   # full dim: always legal

    out = pl.pallas_call(
        _pe_kernel,
        out_shape=jax.ShapeDtypeStruct((total_rows, width), out_dtype),
        grid=(pl.cdiv(total_rows, rows_tile),),
        in_specs=[
            pl.BlockSpec((rows_tile, K_pad), lambda r: (r, 0)),
            pl.BlockSpec((K_pad, width), lambda r: (0, 0)),
        ],
        out_specs=pl.BlockSpec((rows_tile, width), lambda r: (r, 0)),
        compiler_params=pltpu.CompilerParams(
            dimension_semantics=("parallel",),
            vmem_limit_bytes=48 * 1024 * 1024),
    )(aug, E)

    # Packed (total_rows, k*H) -> (B, T_pad, H) is a contiguous (free) reshape.
    pe = out.reshape(B, T_pad, H)
    if T_pad != T:
        pe = pe[:, :T, :]
    return pe


def _reference(position: np.ndarray, out_size: int) -> np.ndarray:
    # Pure-numpy re-implementation of the PyTorch forward.
    div_term = np.exp(
        np.arange(0, out_size, 2, dtype=np.float32)
        * (-math.log(10000.0) / out_size))
    pos = position.astype(np.float32)[:, :, None]      # B x T x 1
    return np.concatenate(
        [np.sin(pos * div_term), np.cos(pos * div_term)], axis=2
    ).astype(np.float32)


if __name__ == "__main__":
    # Main config: H=32 -> k=4 packing, no T padding needed.
    B, T, H = 2, 8, 32
    key = jax.random.PRNGKey(0)
    position = jax.random.uniform(key, (B, T), dtype=jnp.float32) * 100.0

    pe = jax.block_until_ready(float_positional_encoding(position, H))
    ref = _reference(np.asarray(position), H)
    assert pe.shape == (B, T, H), pe.shape
    # cos = sin(x + pi/2) and the bf16_6x (HIGHEST) MXU product add a few
    # f32 ulps of slack at |arg| ~ 100.
    assert np.allclose(np.asarray(pe), ref, atol=1e-4, rtol=1e-5), \
        "mismatch vs reference (f32)"

    # Second config exercises generalized packing (H=8 -> k=16) + T padding.
    B2, T2, H2 = 3, 10, 8
    pos2 = jax.random.uniform(jax.random.PRNGKey(0), (B2, T2),
                              dtype=jnp.float32) * 50.0
    pe2 = jax.block_until_ready(float_positional_encoding(pos2, H2))
    ref2 = _reference(np.asarray(pos2), H2)
    assert pe2.shape == (B2, T2, H2), pe2.shape
    assert np.allclose(np.asarray(pe2), ref2, atol=1e-4, rtol=1e-5), \
        "mismatch vs reference (packed/padded)"

    # bf16 writeback option (halves HBM writeback; loose tolerance for bf16).
    pe_bf16 = jax.block_until_ready(
        float_positional_encoding(position, H, out_dtype=jnp.bfloat16))
    assert pe_bf16.dtype == jnp.bfloat16
    pe_bf16_f32 = np.asarray(pe_bf16.astype(jnp.float32))
    assert np.allclose(pe_bf16_f32, ref, atol=2e-2), "mismatch vs reference (bf16)"

    print("KERNEL_OK")
</pallas_src>

<mosaic_0001>
module attributes {stable_mosaic.version = 11 : i64} {
  func.func @_pe_kernel(%arg0: i32, %arg1: memref<4x8xf32, #tpu.memory_space<vmem>>, %arg2: memref<8x128xf32, #tpu.memory_space<vmem>>, %arg3: memref<4x128xf32, #tpu.memory_space<vmem>>) attributes {dimension_semantics = [#tpu.dimension_semantics<parallel>], iteration_bounds = array<i64: 1>, scalar_prefetch = 0 : i64, scratch_operands = 0 : i64, tpu.core_type = #tpu.core_type<tc>, window_params = [{transform_indices = @transform_0, window_bounds = array<i64: 4, 8>}, {pipeline_mode = #tpu.pipeline_mode<synchronous>, transform_indices = @transform_1, window_bounds = array<i64: 8, 128>}, {transform_indices = @transform_2, window_bounds = array<i64: 4, 128>}]} {
    %c0 = arith.constant 0 : index
    %c0_0 = arith.constant 0 : index
    %0 = vector.load %arg1[%c0, %c0_0] : memref<4x8xf32, #tpu.memory_space<vmem>>, vector<4x8xf32>
    %c0_1 = arith.constant 0 : index
    %c0_2 = arith.constant 0 : index
    %1 = vector.load %arg2[%c0_1, %c0_2] : memref<8x128xf32, #tpu.memory_space<vmem>>, vector<8x128xf32>
    %cst = arith.constant dense<0.000000e+00> : vector<4x128xf32>
    %2 = tpu.matmul %0, %1, %cst {dimension_numbers = #tpu.dot_dimension_numbers<[1], [0], [0], [1], [0, 0, 1, 1], [], []>, precision = #tpu.contract_precision<fp32>} : vector<4x8xf32>, vector<8x128xf32>, vector<4x128xf32> -> vector<4x128xf32>
    %3 = math.sin %2 : vector<4x128xf32>
    %c0_3 = arith.constant 0 : index
    %c0_4 = arith.constant 0 : index
    %4 = vector.load %arg3[%c0_3, %c0_4] : memref<4x128xf32, #tpu.memory_space<vmem>>, vector<4x128xf32>
    tpu.vector_store %arg3[%c0_3, %c0_4], %3 {strides = array<i32>} : memref<4x128xf32, #tpu.memory_space<vmem>>, vector<4x128xf32>,
    return
  }
  func.func @transform_0(%arg0: i32) -> (i32, i32) {
    %c0_i32 = arith.constant 0 : i32
    %c0_i32_0 = arith.constant 0 : i32
    return %arg0, %c0_i32 : i32, i32
  }
  func.func @transform_1(%arg0: i32) -> (i32, i32) {
    %c0_i32 = arith.constant 0 : i32
    %c0_i32_0 = arith.constant 0 : i32
    %c0_i32_1 = arith.constant 0 : i32
    return %c0_i32, %c0_i32_0 : i32, i32
  }
  func.func @transform_2(%arg0: i32) -> (i32, i32) {
    %c0_i32 = arith.constant 0 : i32
    %c0_i32_0 = arith.constant 0 : i32
    return %arg0, %c0_i32 : i32, i32
  }
}

</mosaic_0001>

<bundles_post_ra>
// kernel: tpu_custom_call.1
= control target key start
LH: loop header
LB: loop body
LE: loop exit
PB: predicated region body
PF: predicated region fallthrough
CT: control target
= control target key end

     0   :  { %7 = vsyncpa [#allocation3], 0  ;;  %s547_s0 = inlined_call_operand.hbm [shape: f32[4,8], index: 0, kind: input, shape index: {}]   ;;  %s548_s1 = inlined_call_operand.hbm [shape: f32[8,128], index: 1, kind: input, shape index: {}]   ;;  %s549_s2 = inlined_call_operand.hbm [shape: f32[4,128], index: 2, kind: output, shape index: {}]  }
   0x1   :  { %8 = vsyncpa [#allocation6], 0 }
   0x2   :  { %9 = vsyncpa [#allocation4], 0  ;;  %s15_s11 = sshll.u32 %s547_s0, 4  ;;  %s457_s12 = smov [#allocation2]   ;;  %s16_s11 = int_to_ptr.hbm [resolvable:$true] %s15_s11 }
   0x3   :  { %s17_s13 = sshll.u32 %s457_s12, 4  ;;  %s26_s16 = sshll.u32 %s548_s1, 4  ;;  %s18_s13 = int_to_ptr.vmem [resolvable:$true] %s17_s13  ;;  %s27_s16 = int_to_ptr.hbm [resolvable:$true] %s26_s16 }
   0x4   :  { %20 = dma.hbm_to_vmem [thread:$0]  %s16_s11, 64, %s18_s13, [#allocation3]  }
   0x5   :  { %s458_s17 = smov [#allocation5]  }
   0x6   :  { %s28_s18 = sshll.u32 %s458_s17, 4  ;;  %s29_s18 = int_to_ptr.vmem [resolvable:$true] %s28_s18 }
   0x7   :  { %31 = dma.hbm_to_vmem [thread:$0]  %s27_s16, 128, %s29_s18, [#allocation6]  }
   0x8   :  { %451 = dma.done.wait [#allocation3], 64  }
   0x9   :  { %452 = vsyncadd [#allocation3], 4294967232 }
   0xa   :  { %453 = dma.done.wait [#allocation6], 128  }
   0xb   :  { %454 = vsyncadd [#allocation6], 4294967168  ;;  %vm42_vm0 = vcmask 64512   ;;  %v41_v0 = vld [vmem:[#allocation5] sm:$0xff]  ;;  %v40_v1 = vld [vmem:[#allocation2] sm:$0xf] }
   0xc   :  { %v61_v2 = vand.u32 4294901760, %v41_v0  ;;  %v44_v3 = vsel %vm42_vm0, %v40_v1, 0  ;;  %v459_v35 = vmov 683565275   ;;  %v460_v37 = vmov 2475754826  }
   0xd   :  { %v63_v4 = vand.u32 4294901760, %v44_v3  ;;  %v461_v40 = vmov 2131351028   ;;  %v462_v43 = vmov 2102212464   ;;  %s466_s0 = smov [#allocation7]  }
   0xe   :  { %v88_v5 = vsub.f32 %v41_v0, %v61_v2  ;;  %138 = vmatpush.msra.mxu3 %v61_v2  ;;  %62 = vmatpush.msra.mxu0 %v61_v2  ;;  %v463_v46 = vmov 920167782   ;;  %v464_v49 = vmov 1326507024   ;;  %s353_s1 = sshll.u32 %s466_s0, 4  ;;  %s355_s21 = sshll.u32 %s549_s2, 4  ;;  %s354_s1 = int_to_ptr.vmem [resolvable:$true] %s353_s1  ;;  %s356_s21 = int_to_ptr.hbm [resolvable:$true] %s355_s21 }
   0xf   :  { %v64_v6 = vsub.f32 %v44_v3, %v63_v4 }
  0x10   :  { %115 = vmatpush.msra.mxu2 %v88_v5  ;;  %v89_v7 = vand.u32 4294901760, %v88_v5 }
  0x11   :  { %118 = vmatmul.f32.vlgmr.msra.gmra.mxu2 %v64_v6  ;;  %v65_v8 = vand.u32 4294901760, %v64_v6 }
  0x12   :  { %v90_v9 = vsub.f32 %v88_v5, %v89_v7  ;;  %164 = vmatpush.msrb.mxu0 %v89_v7 }
  0x13   :  { %142 = vmatmul.f32.vlgmr.msra.gmra.mxu3 %v65_v8  ;;  %v66_v10 = vsub.f32 %v64_v6, %v65_v8 }
  0x14   :  { %v91_v11 = vand.u32 4294901760, %v90_v9 }
  0x15   :  { %v67_v12 = vand.u32 4294901760, %v66_v10 }
  0x16   :  { %92 = vmatpush.msra.mxu1 %v91_v11 }
  0x17   :  { %68 = vmatmul.f32.vlgmr.msra.gmra.mxu0 %v67_v12  ;;  %94 = vmatmul.f32.vlgmr.msra.gmra.mxu1 %v63_v4 }
  0x18   :  { %186 = vmatpush.msrb.mxu1 %v61_v2 }
  0x1f   :  { %166 = vmatmul.f32.vlgmr.msrb.gmra.mxu0 %v63_v4  ;;  %188 = vmatmul.f32.vlgmr.msrb.gmra.mxu1 %v63_v4 }
  0x94   :  { %v69_v13 = vpop.f32.mrf.mxu0  ;;  %v95_v14 = vpop.f32.mrf.mxu1 }
  0x95   :  { %v96_v15 = vadd.f32 %v95_v14, %v69_v13  ;;  %v119_v16 = vpop.f32.mrf.mxu2 }
  0x96   :  { %v143_v18 = vpop.f32.mrf.mxu3 }
  0x97   :  { %v120_v17 = vadd.f32 %v119_v16, %v96_v15 }
  0x99   :  { %v144_v19 = vadd.f32 %v143_v18, %v120_v17 }
  0x9c   :  { %v167_v20 = vpop.f32.mrf.mxu0  ;;  %v189_v21 = vpop.f32.mrf.mxu1 }
  0x9d   :  { %v168_v22 = vadd.f32 %v167_v20, %v144_v19  ;;  %v465_v19 = vmov 0  }
  0x9f   :  { %v488_v23 = vadd.f32 %v189_v21, %v168_v22 }
  0xa1   :  { %v195_v24 = vand.u32 2139095040, %v488_v23  ;;  %v192_v27 = vand.u32 2147483647, %v488_v23  ;;  %vm194_vm13 = vcmp.lt.s32.totalorder %v488_v23, 0 }
  0xa3   :  { %v196_v25 = vshrl.u32 %v195_v24, 23  ;;  %v199_v29 = vand.u32 8388607, %v192_v27  ;;  %vm193_vm14 = vcmp.le.f32.partialorder %v192_v27, 0.7853982 }
  0xa5   :  { %v366_v26 = vadd.s32 4294967169, %v196_v25  ;;  %v200_v33 = vor.u32 8388608, %v199_v29 }
  0xa7   :  { %v202_v28 = vadd.s32 1, %v366_v26  ;;  %v505_v56 = vshll.u32 %v200_v33, 8 }
  0xa9   :  { %vm203_vm1 = vcmp.gt.s32.totalorder %v202_v28, 0  ;;  %v241_v1 = vand.u32 65535, %v505_v56  ;;  %v242_v2 = vshrl.u32 %v505_v56, 16 }
  0xaa   :  { %v204_v30 = vsel %vm203_vm1, %v202_v28, 0 }
  0xab   :  { %v206_v31 = vand.u32 31, %v204_v30  ;;  %v496_v34 = vshrl.u32 %v204_v30, 5 }
  0xad   :  { %v494_v32 = vsub.s32 32, %v206_v31  ;;  %v209_v36 = vshll.u32 %v459_v35, %v206_v31  ;;  %v212_v38 = vshll.u32 %v460_v37, %v206_v31  ;;  %v215_v42 = vshll.u32 %v461_v40, %v206_v31 }
  0xae   :  { %v218_v45 = vshll.u32 %v462_v43, %v206_v31  ;;  %v221_v48 = vshll.u32 %v463_v46, %v206_v31  ;;  %vm224_vm2 = vcmp.lt.s32.totalorder %v496_v34, 1  ;;  %vm227_vm3 = vcmp.lt.s32.totalorder %v496_v34, 4 }
  0xaf   :  { %v210_v39 = vshrl.u32 %v460_v37, %v494_v32  ;;  %v213_v41 = vshrl.u32 %v461_v40, %v494_v32  ;;  %v216_v44 = vshrl.u32 %v462_v43, %v494_v32  ;;  %v219_v47 = vshrl.u32 %v463_v46, %v494_v32 }
  0xb0   :  { %v222_v50 = vshrl.u32 %v464_v49, %v494_v32  ;;  %vm226_vm4 = vcmp.lt.s32.totalorder %v496_v34, 3  ;;  %vm225_vm5 = vcmp.lt.s32.totalorder %v496_v34, 2  ;;  %v208_v30 = vshrl.u32 %v459_v35, %v494_v32 }
  0xb1   :  { %v211_v51 = vor.u32 %v210_v39, %v209_v36  ;;  %v214_v52 = vor.u32 %v213_v41, %v212_v38  ;;  %v217_v53 = vor.u32 %v216_v44, %v215_v42  ;;  %v220_v54 = vor.u32 %v219_v47, %v218_v45 }
  0xb2   :  { %v223_v55 = vor.u32 %v222_v50, %v221_v48 }
  0xb3   :  { %v232_v57 = vsel %vm224_vm2, %v211_v51, %v214_v52  ;;  %v236_v58 = vsel %vm224_vm2, %v214_v52, %v217_v53  ;;  %v233_v59 = vsel %vm227_vm3, %v220_v54, 920167782  ;;  %v229_v26 = vsel %vm227_vm3, %v217_v53, 2102212464 }
  0xb4   :  { %v237_v60 = vsel %vm227_vm3, %v223_v55, 1326507024  ;;  %v234_v61 = vsel %vm226_vm4, %v217_v53, %v233_v59  ;;  %v228_v39 = vsel %vm224_vm2, %v208_v30, %v211_v51  ;;  %v230_v40 = vsel %vm226_vm4, %v214_v52, %v229_v26 }
  0xb5   :  { %v238_v62 = vsel %vm226_vm4, %v220_v54, %v237_v60  ;;  %v235_v63 = vsel %vm225_vm5, %v232_v57, %v234_v61  ;;  %v231_v32 = vsel %vm225_vm5, %v228_v39, %v230_v40  ;;  %vm335_vm2 = vweird.f32 %v488_v23 }
  0xb6   :  { %v239_v0 = vsel %vm225_vm5, %v236_v58, %v238_v62  ;;  %v265_v5 = vand.u32 65535, %v235_v63  ;;  %v266_v6 = vshrl.u32 %v235_v63, 16  ;;  %v285_v48 = vmul.u32 %v505_v56, %v231_v32 }
  0xb7   :  { %v243_v3 = vand.u32 65535, %v239_v0  ;;  %v244_v4 = vshrl.u32 %v239_v0, 16 }
  0xb8   :  { %v268_v9 = vmul.u32 %v266_v6, %v241_v1  ;;  %v269_v10 = vmul.u32 %v265_v5, %v242_v2  ;;  %v267_v14 = vmul.u32 %v265_v5, %v241_v1  ;;  %v270_v18 = vmul.u32 %v266_v6, %v242_v2 }
  0xb9   :  { %v246_v7 = vmul.u32 %v244_v4, %v241_v1  ;;  %v247_v8 = vmul.u32 %v243_v3, %v242_v2  ;;  %v245_v11 = vmul.u32 %v243_v3, %v241_v1  ;;  %v248_v13 = vmul.u32 %v244_v4, %v242_v2 }
  0xba   :  { %v271_v15 = vshll.u32 %v268_v9, 16  ;;  %v273_v21 = vshll.u32 %v269_v10, 16  ;;  %v272_v37 = vshrl.u32 %v268_v9, 16  ;;  %v274_v43 = vshrl.u32 %v269_v10, 16 }
  0xbb   :  { %v249_v12 = vshll.u32 %v246_v7, 16  ;;  %v251_v16 = vshll.u32 %v247_v8, 16  ;;  %v250_v31 = vshrl.u32 %v246_v7, 16  ;;  %v252_v41 = vshrl.u32 %v247_v8, 16 }
  0xbc   :  { %vm275_vm7 = vc.u32 %v267_v14, %v271_v15  ;;  %v277_v22 = vadd.s32 %v271_v15, %v267_v14 }
  0xbd   :  { %vm253_vm6 = vc.u32 %v245_v11, %v249_v12  ;;  %v255_v17 = vadd.s32 %v249_v12, %v245_v11  ;;  %v276_v25 = vsel %vm275_vm7, 1, %v465_v19 }
  0xbe   :  { %v254_v20 = vsel %vm253_vm6, 1, %v465_v19  ;;  %v278_v29 = vadd.s32 %v276_v25, %v270_v18  ;;  %vm279_vm9 = vc.u32 %v277_v22, %v273_v21  ;;  %v281_v46 = vadd.s32 %v277_v22, %v273_v21 }
  0xbf   :  { %v256_v24 = vadd.s32 %v254_v20, %v248_v13  ;;  %vm257_vm8 = vc.u32 %v255_v17, %v251_v16  ;;  %v280_v36 = vsel %vm279_vm9, 1, %v465_v19 }
  0xc0   :  { %v258_v28 = vsel %vm257_vm8, 1, %v465_v19  ;;  %v282_v38 = vadd.s32 %v280_v36, %v278_v29 }
  0xc1   :  { %v260_v33 = vadd.s32 %v258_v28, %v256_v24 }
  0xc2   :  { %v283_v44 = vadd.s32 %v282_v38, %v272_v37 }
  0xc3   :  { %v261_v42 = vadd.s32 %v260_v33, %v250_v31 }
  0xc4   :  { %v284_v35 = vadd.s32 %v283_v44, %v274_v43 }
  0xc5   :  { %v262_v45 = vadd.s32 %v261_v42, %v252_v41 }
  0xc6   :  { %v288_v47 = vadd.s32 1, %v284_v35 }
  0xc7   :  { %vm287_vm10 = vc.u32 %v262_v45, %v281_v46  ;;  %v286_v34 = vadd.s32 %v281_v46, %v262_v45 }
  0xc8   :  { %v289_v49 = vsel %vm287_vm10, %v288_v47, %v284_v35 }
  0xc9   :  { %v290_v50 = vadd.s32 %v289_v49, %v285_v48 }
  0xcb   :  { %v291_v51 = vadd.s32 536870912, %v290_v50 }
  0xcd   :  { %v292_v53 = vshrl.u32 %v291_v51, 30 }
  0xcf   :  { %v293_v54 = vshll.u32 %v292_v53, 30  ;;  %v316_v10 = vsub.s32 4, %v292_v53 }
  0xd1   :  { %v294_v52 = vsub.s32 %v290_v50, %v293_v54  ;;  %v317_v14 = vsel %vm194_vm13, %v316_v10, %v292_v53 }
  0xd2   :  { %v319_v17 = vsel %vm193_vm14, 0, %v317_v14 }
  0xd3   :  { %vm295_vm11 = vcmp.lt.s32.totalorder %v294_v52, 0  ;;  %v296_v55 = vsub.s32 0, %v294_v52  ;;  %v336_v22 = vadd.s32 3, %v319_v17 }
  0xd5   :  { %v297_v57 = vsel %vm295_vm11, %v296_v55, %v294_v52  ;;  %v337_v28 = vand.u32 3, %v336_v22 }
  0xd6   :  { %v298_v58 = vclz %v297_v57 }
  0xd7   :  { %vm339_vm15 = vcmp.eq.s32.totalorder %v337_v28, 0  ;;  %vm342_vm0 = vcmp.eq.s32.totalorder %v337_v28, 2  ;;  %vm338_vm1 = vcmp.lt.s32.totalorder %v337_v28, 2 }
  0xd8   :  { %v367_v59 = vadd.s32 4294967294, %v298_v58 }
  0xda   :  { %vm368_vm12 = vcmp.lt.s32.totalorder %v367_v59, 0 }
  0xdb   :  { %v301_v60 = vsel %vm368_vm12, 0, %v367_v59 }
  0xdc   :  { %v302_v61 = vsub.s32 32, %v301_v60  ;;  %v306_v62 = vsub.s32 4294967266, %v301_v60  ;;  %v303_v63 = vshll.u32 %v294_v52, %v301_v60 }
  0xde   :  { %v304_v0 = vshrl.u32 %v286_v34, %v302_v61  ;;  %v307_v1 = vadd.s32 127, %v306_v62 }
  0xe0   :  { %v305_v56 = vor.u32 %v304_v0, %v303_v63  ;;  %v308_v2 = vshll.u32 %v307_v1, 23 }
  0xe2   :  { %v309_v3 = vor.u32 4788187, %v308_v2  ;;  %v312_v5 = vcvt.s32.f32 %v305_v56 }
  0xe4   :  { %v310_v4 = vand.u32 2147483647, %v309_v3 }
  0xe6   :  { %v313_v6 = vmul.f32 %v312_v5, %v310_v4 }
  0xe8   :  { %v314_v7 = vxor.u32 2147483648, %v313_v6 }
  0xea   :  { %v315_v8 = vsel %vm194_vm13, %v314_v7, %v313_v6 }
  0xeb   :  { %v318_v9 = vsel %vm193_vm14, %v488_v23, %v315_v8 }
  0xec   :  { %v320_v11 = vmul.f32 %v318_v9, %v318_v9 }
  0xee   :  { %v321_v12 = vmul.f32 -0.001358992, %v320_v11  ;;  %v328_v13 = vmul.f32 -0.00019511016, %v320_v11 }
  0xf0   :  { %v322_v15 = vadd.f32 0.041655596, %v321_v12  ;;  %v329_v16 = vadd.f32 0.008332121, %v328_v13 }
  0xf2   :  { %v323_v18 = vmul.f32 %v322_v15, %v320_v11  ;;  %v330_v19 = vmul.f32 %v329_v16, %v320_v11 }
  0xf4   :  { %v324_v20 = vadd.f32 -0.4999988, %v323_v18  ;;  %v331_v21 = vadd.f32 -0.16666654, %v330_v19 }
  0xf6   :  { %v325_v24 = vmul.f32 %v324_v20, %v320_v11  ;;  %v332_v25 = vmul.f32 %v331_v21, %v320_v11 }
  0xf8   :  { %v326_v26 = vadd.f32 1.0, %v325_v24  ;;  %v333_v27 = vadd.f32 1.0, %v332_v25 }
  0xfa   :  { %v334_v29 = vmul.f32 %v333_v27, %v318_v9  ;;  %v343_v30 = vxor.u32 2147483648, %v326_v26 }
  0xfc   :  { %v340_v31 = vxor.u32 2147483648, %v334_v29  ;;  %v344_v36 = vsel %vm342_vm0, %v343_v30, %v334_v29 }
  0xfe   :  { %v341_v33 = vsel %vm339_vm15, %v326_v26, %v340_v31 }
  0xff   :  { %v345_v37 = vsel %vm338_vm1, %v341_v33, %v344_v36 }
 0x100   :  { %v346_v38 = vsel %vm335_vm2, nan, %v345_v37 }
 0x101   :  { %347 = vst [vmem:[#allocation7] sm:$0xf] %v346_v38 }
 0x102   :  { %358 = dma.vmem_to_hbm [thread:$0]  %s354_s1, 64, %s356_s21, [#allocation4]  }
 0x103   :  { %455 = dma.done.wait [#allocation4], 64  }
 0x104   :  { %456 = vsyncadd [#allocation4], 4294967232 }
 0x105   :  { %363 = vsyncpa [#allocation3], 1 }
 0x106   :  { %364 = vsyncpa [#allocation6], 1 }
 0x107   :  { %365 = vsyncpa [#allocation4], 1 }

</bundles_post_ra>
